<compile_context>
chip_gen: v7x
topology: tpu7x:2x2x1
jax: 0.10.0
libtpu: 0.0.40
codegen_flags: <defaults>
</compile_context>

<pallas_src>
import jax
import jax.numpy as jnp
import numpy as np
from jax.experimental import pallas as pl
from jax.experimental.pallas import tpu as pltpu


# ---------------------------------------------------------------------------
# host-side weight construction (PyTorch align_corners=False, half-pixel)
# ---------------------------------------------------------------------------
def _linear_weight_matrix_np(in_size, out_size):
    """(out_size, in_size) 1-D linear-interp matrix (align_corners=False)."""
    scale = in_size / out_size
    o = np.arange(out_size, dtype=np.float64)
    src = np.maximum((o + 0.5) * scale - 0.5, 0.0)  # torch clamps src >= 0
    i0 = np.minimum(np.floor(src).astype(np.int64), in_size - 1)
    i1 = np.minimum(i0 + 1, in_size - 1)
    lam = src - i0.astype(np.float64)
    w = np.zeros((out_size, in_size), np.float64)
    rows = np.arange(out_size)
    np.add.at(w, (rows, i0), 1.0 - lam)  # handles i0 == i1 at edges (sums to 1)
    np.add.at(w, (rows, i1), lam)
    return w


def _pick_channel_block(nc, target=8):
    """Largest divisor of nc that is <= target while keeping >= 2 grid steps."""
    cap = nc if nc < 2 else max(1, nc // 2)
    best = 1
    for cb in range(1, min(target, cap) + 1):
        if nc % cb == 0:
            best = cb
    return best


# ---------------------------------------------------------------------------
# fused trilinear kernel: one HBM read + one HBM write per element
# ---------------------------------------------------------------------------
def _trilinear_kernel(x_ref, khw_ref, wd_ref, o_ref):
    # x_ref  : (Cb, Di, Hi*Wi)     input block (VMEM)
    # khw_ref: (Hi*Wi, Oh*Ow)      kron(Wh, Ww)^T
    # wd_ref : (Od, Di)            depth interp matrix
    # o_ref  : (Cb, Od, Oh*Ow)     output block (lane-dense last dim)
    cb, di, hwi = x_ref.shape
    ohow = khw_ref.shape[1]

    # Fused H+W interpolation for all channels / depth slices of the block:
    # (Cb*Di, Hi*Wi) @ (Hi*Wi, Oh*Ow) -> (Cb*Di, Oh*Ow)   [MXU, f32 accum]
    x2 = x_ref[...].reshape(cb * di, hwi)
    t = jnp.dot(x2, khw_ref[...], preferred_element_type=jnp.float32)
    t = t.reshape(cb, di, ohow)

    # Depth interpolation, in-VMEM, per channel of the block (static unroll):
    # (Od, Di) @ (Di, Oh*Ow) -> (Od, Oh*Ow)
    wd = wd_ref[...].astype(jnp.float32)
    for c in range(cb):
        o_ref[c] = jnp.dot(wd, t[c],
                           preferred_element_type=jnp.float32).astype(o_ref.dtype)


class Interpolate:
    """JAX/Pallas port of the PyTorch Interpolate module (trilinear, align_corners=False)."""

    def __init__(self, size, mode="trilinear"):
        self.size = tuple(int(s) for s in size)
        self.mode = "trilinear"  # the reference module forces trilinear
        self._wcache = {}

    def _weights(self, in_dhw, dtype):
        key = (in_dhw, jnp.dtype(dtype).name)
        if key not in self._wcache:
            di, hi, wi = in_dhw
            od, oh, ow = self.size
            np_dt = np.dtype(dtype)
            wd = _linear_weight_matrix_np(di, od).astype(np_dt)        # (Od, Di)
            wh = _linear_weight_matrix_np(hi, oh)
            ww = _linear_weight_matrix_np(wi, ow)
            khw_t = np.kron(wh, ww).T.astype(np_dt)                    # (Hi*Wi, Oh*Ow)
            self._wcache[key] = (jnp.asarray(khw_t), jnp.asarray(wd))
        return self._wcache[key]

    def __call__(self, x):
        # x: (N, C, D, H, W), matching torch.nn.functional.interpolate on 5-D input.
        n, c, di, hi, wi = x.shape
        od, oh, ow = self.size
        khw_t, wd = self._weights((di, hi, wi), x.dtype)

        nc = n * c
        cb = _pick_channel_block(nc)
        hwi, ohow = hi * wi, oh * ow

        x3 = x.reshape(nc, di, hwi)  # merge batch/channel; flatten H,W onto lanes

        out = pl.pallas_call(
            _trilinear_kernel,
            out_shape=jax.ShapeDtypeStruct((nc, od, ohow), x.dtype),
            grid=(nc // cb,),
            in_specs=[
                pl.BlockSpec((cb, di, hwi), lambda i: (i, 0, 0)),
                pl.BlockSpec((hwi, ohow), lambda i: (0, 0)),
                pl.BlockSpec((od, di), lambda i: (0, 0)),
            ],
            out_specs=pl.BlockSpec((cb, od, ohow), lambda i: (i, 0, 0)),
            compiler_params=pltpu.CompilerParams(
                dimension_semantics=("parallel",)),
        )(x3, khw_t, wd)

        return out.reshape(n, c, od, oh, ow)


if __name__ == "__main__":
    key = jax.random.PRNGKey(0)
    # Small shapes consistent with a 3-D U-Net feature map: NCDHW
    x = jax.random.normal(key, (2, 4, 8, 8, 8), dtype=jnp.float32)

    size = (16, 16, 16)
    mod = Interpolate(size=size, mode="trilinear")
    out = jax.block_until_ready(mod(x))
    assert out.shape == (2, 4, *size), out.shape
    assert out.dtype == x.dtype

    # pure-JAX separable reference using the same align_corners=False weights
    w_d = jnp.asarray(_linear_weight_matrix_np(8, size[0]).astype(np.float32))
    w_h = jnp.asarray(_linear_weight_matrix_np(8, size[1]).astype(np.float32))
    w_w = jnp.asarray(_linear_weight_matrix_np(8, size[2]).astype(np.float32))
    ref = jnp.einsum("Dd,Hh,Ww,ncdhw->ncDHW", w_d, w_h, w_w, x)
    assert jnp.allclose(out, ref, atol=1e-5, rtol=1e-5), float(jnp.max(jnp.abs(out - ref)))

    print("KERNEL_OK")
</pallas_src>

<mosaic_0001>
module attributes {stable_mosaic.version = 11 : i64} {
  func.func @_trilinear_kernel(%arg0: i32, %arg1: memref<4x8x64xf32, #tpu.memory_space<vmem>>, %arg2: memref<64x256xf32, #tpu.memory_space<vmem>>, %arg3: memref<16x8xf32, #tpu.memory_space<vmem>>, %arg4: memref<4x16x256xf32, #tpu.memory_space<vmem>>) attributes {dimension_semantics = [#tpu.dimension_semantics<parallel>], iteration_bounds = array<i64: 2>, scalar_prefetch = 0 : i64, scratch_operands = 0 : i64, tpu.core_type = #tpu.core_type<tc>, window_params = [{transform_indices = @transform_0, window_bounds = array<i64: 4, 8, 64>}, {pipeline_mode = #tpu.pipeline_mode<synchronous>, transform_indices = @transform_1, window_bounds = array<i64: 64, 256>}, {pipeline_mode = #tpu.pipeline_mode<synchronous>, transform_indices = @transform_2, window_bounds = array<i64: 16, 8>}, {transform_indices = @transform_3, window_bounds = array<i64: 4, 16, 256>}]} {
    %c0 = arith.constant 0 : index
    %c0_0 = arith.constant 0 : index
    %c0_1 = arith.constant 0 : index
    %0 = vector.load %arg1[%c0, %c0_0, %c0_1] : memref<4x8x64xf32, #tpu.memory_space<vmem>>, vector<4x8x64xf32>
    %1 = vector.shape_cast %0 : vector<4x8x64xf32> to vector<32x64xf32>
    %c0_2 = arith.constant 0 : index
    %c0_3 = arith.constant 0 : index
    %2 = vector.load %arg2[%c0_2, %c0_3] : memref<64x256xf32, #tpu.memory_space<vmem>>, vector<64x256xf32>
    %cst = arith.constant dense<0.000000e+00> : vector<32x256xf32>
    %3 = tpu.matmul %1, %2, %cst {dimension_numbers = #tpu.dot_dimension_numbers<[1], [0], [0], [1], [0, 0, 1, 1], [], []>} : vector<32x64xf32>, vector<64x256xf32>, vector<32x256xf32> -> vector<32x256xf32>
    %4 = vector.shape_cast %3 : vector<32x256xf32> to vector<4x8x256xf32>
    %c0_4 = arith.constant 0 : index
    %c0_5 = arith.constant 0 : index
    %5 = vector.load %arg3[%c0_4, %c0_5] : memref<16x8xf32, #tpu.memory_space<vmem>>, vector<16x8xf32>
    %6 = vector.extract_strided_slice %4 {offsets = [0, 0, 0], sizes = [1, 8, 256], strides = [1, 1, 1]} : vector<4x8x256xf32> to vector<1x8x256xf32>
    %7 = vector.shape_cast %6 : vector<1x8x256xf32> to vector<8x256xf32>
    %cst_6 = arith.constant dense<0.000000e+00> : vector<16x256xf32>
    %8 = tpu.matmul %5, %7, %cst_6 {dimension_numbers = #tpu.dot_dimension_numbers<[1], [0], [0], [1], [0, 0, 1, 1], [], []>} : vector<16x8xf32>, vector<8x256xf32>, vector<16x256xf32> -> vector<16x256xf32>
    %c0_7 = arith.constant 0 : index
    %c0_8 = arith.constant 0 : index
    %c0_9 = arith.constant 0 : index
    %9 = vector.load %arg4[%c0_7, %c0_8, %c0_9] : memref<4x16x256xf32, #tpu.memory_space<vmem>>, vector<1x16x256xf32>
    %10 = vector.shape_cast %9 : vector<1x16x256xf32> to vector<16x256xf32>
    %11 = vector.shape_cast %8 : vector<16x256xf32> to vector<1x16x256xf32>
    tpu.vector_store %arg4[%c0_7, %c0_8, %c0_9], %11 {strides = array<i32>} : memref<4x16x256xf32, #tpu.memory_space<vmem>>, vector<1x16x256xf32>,
    %12 = vector.extract_strided_slice %4 {offsets = [1, 0, 0], sizes = [1, 8, 256], strides = [1, 1, 1]} : vector<4x8x256xf32> to vector<1x8x256xf32>
    %13 = vector.shape_cast %12 : vector<1x8x256xf32> to vector<8x256xf32>
    %cst_10 = arith.constant dense<0.000000e+00> : vector<16x256xf32>
    %14 = tpu.matmul %5, %13, %cst_10 {dimension_numbers = #tpu.dot_dimension_numbers<[1], [0], [0], [1], [0, 0, 1, 1], [], []>} : vector<16x8xf32>, vector<8x256xf32>, vector<16x256xf32> -> vector<16x256xf32>
    %c1 = arith.constant 1 : index
    %c0_11 = arith.constant 0 : index
    %c0_12 = arith.constant 0 : index
    %15 = vector.load %arg4[%c1, %c0_11, %c0_12] : memref<4x16x256xf32, #tpu.memory_space<vmem>>, vector<1x16x256xf32>
    %16 = vector.shape_cast %15 : vector<1x16x256xf32> to vector<16x256xf32>
    %17 = vector.shape_cast %14 : vector<16x256xf32> to vector<1x16x256xf32>
    tpu.vector_store %arg4[%c1, %c0_11, %c0_12], %17 {strides = array<i32>} : memref<4x16x256xf32, #tpu.memory_space<vmem>>, vector<1x16x256xf32>,
    %18 = vector.extract_strided_slice %4 {offsets = [2, 0, 0], sizes = [1, 8, 256], strides = [1, 1, 1]} : vector<4x8x256xf32> to vector<1x8x256xf32>
    %19 = vector.shape_cast %18 : vector<1x8x256xf32> to vector<8x256xf32>
    %cst_13 = arith.constant dense<0.000000e+00> : vector<16x256xf32>
    %20 = tpu.matmul %5, %19, %cst_13 {dimension_numbers = #tpu.dot_dimension_numbers<[1], [0], [0], [1], [0, 0, 1, 1], [], []>} : vector<16x8xf32>, vector<8x256xf32>, vector<16x256xf32> -> vector<16x256xf32>
    %c2 = arith.constant 2 : index
    %c0_14 = arith.constant 0 : index
    %c0_15 = arith.constant 0 : index
    %21 = vector.load %arg4[%c2, %c0_14, %c0_15] : memref<4x16x256xf32, #tpu.memory_space<vmem>>, vector<1x16x256xf32>
    %22 = vector.shape_cast %21 : vector<1x16x256xf32> to vector<16x256xf32>
    %23 = vector.shape_cast %20 : vector<16x256xf32> to vector<1x16x256xf32>
    tpu.vector_store %arg4[%c2, %c0_14, %c0_15], %23 {strides = array<i32>} : memref<4x16x256xf32, #tpu.memory_space<vmem>>, vector<1x16x256xf32>,
    %24 = vector.extract_strided_slice %4 {offsets = [3, 0, 0], sizes = [1, 8, 256], strides = [1, 1, 1]} : vector<4x8x256xf32> to vector<1x8x256xf32>
    %25 = vector.shape_cast %24 : vector<1x8x256xf32> to vector<8x256xf32>
    %cst_16 = arith.constant dense<0.000000e+00> : vector<16x256xf32>
    %26 = tpu.matmul %5, %25, %cst_16 {dimension_numbers = #tpu.dot_dimension_numbers<[1], [0], [0], [1], [0, 0, 1, 1], [], []>} : vector<16x8xf32>, vector<8x256xf32>, vector<16x256xf32> -> vector<16x256xf32>
    %c3 = arith.constant 3 : index
    %c0_17 = arith.constant 0 : index
    %c0_18 = arith.constant 0 : index
    %27 = vector.load %arg4[%c3, %c0_17, %c0_18] : memref<4x16x256xf32, #tpu.memory_space<vmem>>, vector<1x16x256xf32>
    %28 = vector.shape_cast %27 : vector<1x16x256xf32> to vector<16x256xf32>
    %29 = vector.shape_cast %26 : vector<16x256xf32> to vector<1x16x256xf32>
    tpu.vector_store %arg4[%c3, %c0_17, %c0_18], %29 {strides = array<i32>} : memref<4x16x256xf32, #tpu.memory_space<vmem>>, vector<1x16x256xf32>,
    return
  }
  func.func @transform_0(%arg0: i32) -> (i32, i32, i32) {
    %c0_i32 = arith.constant 0 : i32
    %c0_i32_0 = arith.constant 0 : i32
    %c0_i32_1 = arith.constant 0 : i32
    return %arg0, %c0_i32, %c0_i32_0 : i32, i32, i32
  }
  func.func @transform_1(%arg0: i32) -> (i32, i32) {
    %c0_i32 = arith.constant 0 : i32
    %c0_i32_0 = arith.constant 0 : i32
    %c0_i32_1 = arith.constant 0 : i32
    return %c0_i32, %c0_i32_0 : i32, i32
  }
  func.func @transform_2(%arg0: i32) -> (i32, i32) {
    %c0_i32 = arith.constant 0 : i32
    %c0_i32_0 = arith.constant 0 : i32
    %c0_i32_1 = arith.constant 0 : i32
    return %c0_i32, %c0_i32_0 : i32, i32
  }
  func.func @transform_3(%arg0: i32) -> (i32, i32, i32) {
    %c0_i32 = arith.constant 0 : i32
    %c0_i32_0 = arith.constant 0 : i32
    %c0_i32_1 = arith.constant 0 : i32
    return %arg0, %c0_i32, %c0_i32_0 : i32, i32, i32
  }
}

</mosaic_0001>

<bundles_post_ra>
// kernel: tpu_custom_call.1
= control target key start
LH: loop header
LB: loop body
LE: loop exit
PB: predicated region body
PF: predicated region fallthrough
CT: control target
= control target key end

     0   :  { %8 = vsyncpa [#allocation3], 0  ;;  %s1299_s0 = inlined_call_operand.hbm [shape: f32[8,8,64], index: 0, kind: input, shape index: {}]   ;;  %s1300_s1 = inlined_call_operand.hbm [shape: f32[64,256], index: 1, kind: input, shape index: {}]   ;;  %s1301_s2 = inlined_call_operand.vmem [shape: f32[16,8], index: 2, kind: input, shape index: {}]   ;;  %s1302_s3 = inlined_call_operand.hbm [shape: f32[8,16,256], index: 3, kind: output, shape index: {}]  }
   0x1   :  { %10 = vsyncpa [#allocation3 + $0x1], 0 }
   0x2   :  { %11 = vsyncpa [#allocation6], 0 }
   0x3   :  { %12 = vsyncpa [#allocation4], 0 }
   0x4   :  { %14 = vsyncpa [#allocation4 + $0x1], 0  ;;  %s1046_s12 = smov 0   ;;  %s1048_s13 = smov 0  }
   0x5   :  { %s1050_s14 = smov 0   ;;  %s1052_s15 = smov 0  }
   0x6 LB: > { %s1067_s16 = sadd.s32 4294967295, %s1014_s15   ;;  %s762_s17 = sadd.s32 4294967294, %s1014_s15   ;;  %s1014_s15 = sphi %s1052_s15, %s1322_s15   ;;  %s1010_s14 = sphi %s1050_s14, %s1321_s14   ;;  %s1006_s13 = sphi %s1048_s13, %s1320_s13   ;;  %s1002_s12 = sphi %s1046_s12, %s1319_s12  }
   0x7   : > { %p40_p0 = scmp.ne.s32.totalorder %s1006_s13, %s1002_s12  ;;  %p1303_p1 = scmp.eq.s32.totalorder %s1067_s16, 0 }
   0x8   : > { %p112_p3 = scmp.eq.s32.totalorder %s762_s17, 1  ;;  %p763_p5 = scmp.ge.s32.totalorder %s1014_s15, 1 }
   0x9   : > { %p1076_p4 = por %p1303_p1, %p40_p0  ;;  %p119_p7 = scmp.lt.s32.totalorder %s1014_s15, 3 }
   0xa   : > { %p1081_p6 = por %p112_p3, %p40_p0  ;;  %s1016_s21 = smov [#allocation5]  }
   0xb   : > { %s1306_s18 = scalar_select %p1076_p4, 1, 0 }
   0xc   : > { %s1307_s19 = scalar_select %p1081_p6, 1, 0 }
   0xd   : > { %p1086_p8 = pnand %p763_p5, %p119_p7  ;;  %s131_s22 = sshll.u32 %s1016_s21, 4  ;;  %s1090_s22 = int_to_ptr.vmem [resolvable:$true] %s131_s22 }
   0xe   : > { %s1102_s24 = sadd.s32 1, %s1014_s15   ;;  %s27_s25 = sadd.s32 1, %s1010_s14 }
   0xf   : > { %s1308_s20 = scalar_select %p1086_p8, 1, 0 }
  0x10   : > { %p830_p9 = pneg %p1086_p8  ;;  %s24_s26 = ssub.s32 %s1014_s15, %s1102_s24 }
  0x11   : > { %s886_s29 = scalar_lea.hbm %s1300_s1, 2048 }
  0x12   : > { %p1097_p11 = pnand %p830_p9, %p1303_p1  ;;  %p887_p12 = scmp.ne.s32.totalorder %s1300_s1, %s886_s29 }
  0x13   : > { %p893_p5 = scmp.lt.u32.totalorder %s886_s29, %s1300_s1 }
  0x14   : > { %p888_p13 = pneg %p1097_p11 }
  0x16   : > { %p889_p0 = pnand %p888_p13, %p887_p12 }
  0x18   : > { %p890_p3 = pneg %p889_p0 }
  0x1a   : > { %p895_p7 = pnand %p893_p5, %p890_p3 }
  0x1c   : > { %898 = shalt.err (!%p895_p7)
}
  0x1d   : > { %s899_s7 = scalar_lea.vmem %s1090_s22, 2048  ;;  %p907_p2 = scmp.lt.s32.totalorder %s1090_s22, %s1090_s22 }
  0x1e   : > { %p900_p9 = scmp.ne.s32.totalorder %s1090_s22, %s899_s7  ;;  %p908_p6 = scmp.lt.s32.totalorder %s899_s7, %s899_s7 }
  0x20   : > { %p902_p10 = pnand %p900_p9, %p888_p13  ;;  %p909_p4 = por %p908_p6, %p907_p2 }
  0x22   : > { %p903_p1 = pneg %p902_p10 }
  0x24   : > { %p910_p8 = pnand %p909_p4, %p903_p1 }
  0x26   : > { %913 = shalt.err (!%p910_p8)
}
  0x27   : > { %s1017_s8 = smov 256   ;;  %s1018_s9 = smov 16  }
  0x28   : > { %833 = dma.hbm_to_vmem [thread:$0]  (!%p1097_p11), %s1300_s1, 2048, %s1090_s22, [#allocation6], %s1017_s8, %s1017_s8, %s1018_s9  }
  0x29   : > { %p25_p2 = scmp.eq.s32.totalorder %s24_s26, 0  ;;  %p34_p1 = scmp.ne.s32.totalorder %s1010_s14, %s1006_s13 }
  0x2a   : > { %p35_p4 = scmp.eq.s32.totalorder %s1014_s15, 0  ;;  %p843_p6 = scmp.lt.s32.totalorder %s1014_s15, 2 }
  0x2b   : > { %s1133_s17 = scalar_select %p25_p2, %s1010_s14, %s27_s25  }
  0x2c   : > { %p36_p8 = por %p35_p4, %p34_p1  ;;  %p1310_p10 = scmp.eq.s32.totalorder %s1067_s16, 1 }
  0x2d   : > { %s148_s27 = sand.u32 1, %s1010_s14   ;;  %s803_s28 = sshll.u32 %s1014_s15, 9 }
  0x2e   : > { %p1137_p12 = por %p1310_p10, %p34_p1  ;;  %s766_s29 = sshll.u32 %s148_s27, 5 }
  0x2f   : > { %s1146_s4 = scalar_lea.hbm %s1299_s0, %s803_s28  ;;  %s152_s22 = scalar_lea.vmem [#allocation2], %s766_s29 }
  0x30   : > { %s159_s25 = sshll.u32 %s152_s22, 4  ;;  %p1148_p11 = pnand %p843_p6, %p36_p8  ;;  %s1152_s25 = int_to_ptr.vmem [resolvable:$true] %s159_s25 }
  0x31   : > { %s1154_s5 = scalar_lea.sflag [#allocation3], %s148_s27  ;;  %s914_s6 = scalar_lea.hbm %s1146_s4, 512 }
  0x32   : > { %p915_p13 = scmp.ne.s32.totalorder %s1146_s4, %s914_s6  ;;  %p916_p0 = pneg %p1148_p11 }
  0x33   : > { %s919_s9 = scalar_lea.hbm %s1299_s0, 1024  ;;  %p920_p7 = scmp.lt.u32.totalorder %s1146_s4, %s1299_s0 }
  0x34   : > { %p917_p3 = pnand %p916_p0, %p915_p13  ;;  %p921_p9 = scmp.lt.u32.totalorder %s919_s9, %s914_s6 }
  0x35   : > { %p923_p1 = scmp.lt.u32.totalorder %s914_s6, %s1146_s4 }
  0x36   : > { %p918_p5 = pneg %p917_p3  ;;  %p922_p2 = por %p921_p9, %p920_p7 }
  0x38   : > { %p924_p4 = por %p923_p1, %p922_p2 }
  0x3a   : > { %p925_p6 = pnand %p924_p4, %p918_p5 }
  0x3c   : > { %928 = shalt.err (!%p925_p6)
}
  0x3d   : > { %s929_s27 = scalar_lea.vmem %s1152_s25, 512  ;;  %s1019_s28 = smov [#allocation2]  }
  0x3e   : > { %p930_p8 = scmp.ne.s32.totalorder %s1152_s25, %s929_s27  ;;  %s934_s29 = sshll.u32 %s1019_s28, 4  ;;  %s935_s29 = int_to_ptr.vmem [resolvable:$false] %s934_s29 }
  0x3f   : > { %s936_s23 = scalar_lea.vmem %s935_s29, 1024  ;;  %p937_p3 = scmp.lt.s32.totalorder %s1152_s25, %s935_s29 }
  0x40   : > { %p932_p10 = pnand %p930_p8, %p916_p0  ;;  %p938_p7 = scmp.lt.s32.totalorder %s936_s23, %s929_s27 }
  0x42   : > { %p933_p13 = pneg %p932_p10  ;;  %p939_p9 = por %p938_p7, %p937_p3 }
  0x44   : > { %p940_p2 = pnand %p939_p9, %p933_p13 }
  0x46   : > { %943 = shalt.err (!%p940_p2)
}
  0x47   : > { %s1020_s30 = smov 128   ;;  %s1021_s22 = smov 8  }
  0x48   : > { %837 = dma.hbm_to_vmem [thread:$0]  (!%p1148_p11), %s1146_s4, 512, %s1152_s25, %s1154_s5, %s1020_s30, %s1020_s30, %s1021_s22  }
  0x49   : > { %p1313_p0 = scmp.ne.s32.totalorder %s1308_s20, 0 }
  0x4a   : > { %s1185_s6 = sand.u32 (!%p1313_p0), 1, %s1006_s13   ;;  %p1314_p5 = scmp.ne.s32.totalorder (!%p1313_p0), %s1306_s18, 0 }
  0x4b   : > { %171 = sbr.rel (%p1313_p0) target bundleno = 576 (0x240), region = 32  ;;  %s770_s7 = sshll.u32 (!%p1313_p0), %s1185_s6, 5 }
  0x4c   : > { %s174_s8 = scalar_lea.sflag (!%p1313_p0), [#allocation3], %s1185_s6  ;;  %s1189_s9 = scalar_lea.vmem (!%p1313_p0), [#allocation2], %s770_s7 }
  0x52   : > { %989 = dma.done.wait (%p1314_p5), %s174_s8, 512  }
  0x53   : > { %991 = vsyncadd (%p1314_p5), %s174_s8, 4294966784  ;;  %p1315_p11 = scmp.eq.s32.totalorder %s1067_s16, 0 }
  0x55   : > { %993 = dma.done.wait (%p1315_p11), [#allocation6], 2048   ;;  %p1316_p1 = pmov %p1315_p11 }
  0x56   : > { %v1022_v0 = vmov 0.0   ;;  %v211_v1 = vld [vmem:[#allocation5 + $0x8] sm:$0xff]  ;;  %v213_v2 = vld [vmem:[#allocation5 + $0x18] sm:$0xff]  ;;  %v210_v3 = vld [vmem:[#allocation5] sm:$0xff]  ;;  %vm226_vm0 = vcmask 523264   ;;  %vm330_vm1 = vcmask 64512  }
  0x57   : > { %995 = vsyncadd (%p1316_p1), [#allocation6], 4294965248  ;;  %303 = vmatprep.mubr.f32.mxu0 %v1022_v0  ;;  %401 = vmatprep.mubr.f32.mxu1 %v1022_v0  ;;  %v806_v4 = vpack.c.bf16 %v213_v2, %v211_v1  ;;  %v212_v5 = vld [vmem:[#allocation5 + $0x10] sm:$0xff]  ;;  %v215_v6 = vld [vmem:[#allocation5 + $0x28] sm:$0xff]  ;;  %s772_s26 = sshll.u32 %s1185_s6, 7  ;;  %s805_s10 = sshll.u32 %s1067_s16, 11 }
  0x58   : > { %v217_v7 = vld [vmem:[#allocation5 + $0x38] sm:$0xff]  ;;  %v808_v8 = vpack.c.bf16 %v212_v5, %v210_v3  ;;  %v214_v10 = vld [vmem:[#allocation5 + $0x20] sm:$0xff]  ;;  %v216_v11 = vld [vmem:[#allocation5 + $0x30] sm:$0xff]  ;;  %s1230_s5 = scalar_lea.vmem [#allocation7], %s772_s26  ;;  %s1251_s29 = scalar_lea.hbm %s1302_s3, %s805_s10 }
  0x59   : > { %v810_v9 = vpack.c.bf16 %v217_v7, %v215_v6  ;;  %v219_v12 = vld [vmem:[#allocation5 + $0x48] sm:$0xff]  ;;  %807 = vmatprep.subr.bf16.mxu0 %v806_v4  ;;  %v221_v13 = vld [vmem:[#allocation5 + $0x58] sm:$0xff]  ;;  %v812_v14 = vpack.c.bf16 %v216_v11, %v214_v10  ;;  %v218_v16 = vld [vmem:[#allocation5 + $0x40] sm:$0xff]  ;;  %s679_s11 = sshll.u32 %s1230_s5, 4  ;;  %s665_s23 = scalar_lea.sflag [#allocation4], %s1185_s6  ;;  %s1253_s11 = int_to_ptr.vmem [resolvable:$true] %s679_s11 }
  0x5a   : > { %809 = vmatpush1.bf16.msra.mxu0 %v808_v8  ;;  %v814_v15 = vpack.c.bf16 %v221_v13, %v219_v12  ;;  %v220_v17 = vld [vmem:[#allocation5 + $0x50] sm:$0xff]  ;;  %v223_v18 = vld [vmem:[#allocation5 + $0x68] sm:$0xff]  ;;  %v225_v19 = vld [vmem:[#allocation5 + $0x78] sm:$0xff]  ;;  %s944_s16 = scalar_lea.vmem %s1253_s11, 2048  ;;  %s1023_s30 = smov [#allocation7]  }
  0x5b   : > { %811 = vmatprep.subr.bf16.mxu0 %v810_v9  ;;  %v816_v20 = vpack.c.bf16 %v220_v17, %v218_v16  ;;  %v818_v21 = vpack.c.bf16 %v225_v19, %v223_v18  ;;  %v222_v22 = vld [vmem:[#allocation5 + $0x60] sm:$0xff]  ;;  %v224_v23 = vld [vmem:[#allocation5 + $0x70] sm:$0xff]  ;;  %v207_v26 = vld [vmem:[%s1189_s9 + $0x8] sm:$0xff]  ;;  %p945_p4 = scmp.ne.s32.totalorder %s1253_s11, %s944_s16  ;;  %s948_s22 = sshll.u32 %s1023_s30, 4  ;;  %s949_s22 = int_to_ptr.vmem [resolvable:$false] %s948_s22 }
  0x5c   : > { %v820_v24 = vpack.c.bf16 %v224_v23, %v222_v22  ;;  %v206_v25 = vld [vmem:[%s1189_s9] sm:$0xff]  ;;  %v208_v27 = vld [vmem:[%s1189_s9 + $0x10] sm:$0xff]  ;;  %v209_v28 = vld [vmem:[%s1189_s9 + $0x18] sm:$0xff]  ;;  %s950_s7 = scalar_lea.vmem %s949_s22, 4096  ;;  %p951_p10 = scmp.lt.s32.totalorder %s1253_s11, %s949_s22 }
  0x5d   : > { %v328_v31 = vld [vmem:[%s1301_s2] sm:$0xff]  ;;  %v329_v34 = vld [vmem:[%s1301_s2 + $0x8] sm:$0xff]  ;;  %p946_p6 = pnand %p945_p4, %p1137_p12  ;;  %p952_p13 = scmp.lt.s32.totalorder %s950_s7, %s944_s16 }
  0x5e   : > { %813 = vmatpush1.bf16.msra.mxu0 %v812_v14 }
  0x5f   : > { %815 = vmatprep.subr.bf16.mxu0 %v814_v15  ;;  %p947_p8 = pneg %p946_p6  ;;  %p953_p3 = por %p952_p13, %p951_p10 }
  0x61   : > { %p954_p7 = pnand %p953_p3, %p947_p8 }
  0x62   : > { %817 = vmatpush1.bf16.msra.mxu0 %v816_v20 }
  0x63   : > { %819 = vmatprep.subr.bf16.mxu0 %v818_v21 }
  0x66   : > { %821 = vmatpush1.bf16.msra.mxu0 %v820_v24 }
  0x69   : > { %773 = vmatmul.mubr.msk.f32.vlgmr.msra.gmra.mrb[0].mxu0 %vm226_vm0, %v206_v25 }
  0x6a   : > { %309 = vmatprep.mubr.f32.mxu0 %v1022_v0 }
  0x6d   : > { %774 = vmatmul.mubr.msk.f32.gmra.mrb[2].mxu0 %vm226_vm0, %v207_v26 }
  0x6e   : > { %315 = vmatprep.mubr.f32.mxu0 %v1022_v0 }
  0x71   : > { %775 = vmatmul.mubr.msk.f32.gmra.mrb[4].mxu0 %vm226_vm0, %v208_v27 }
  0x72   : > { %321 = vmatprep.mubr.f32.mxu0 %v1022_v0 }
  0x75   : > { %776 = vmatmul.mubr.msk.f32.gmra.mrb[6].mxu0 %vm226_vm0, %v209_v28 }
 0x13c   : > { %v305_v29 = vpop.f32.mrb[0].mxu0 }
 0x13d   : > { %v307_v30 = vpop.f32.mrb[1].mxu0 }
 0x13e   : > { %337 = vmatprep.subr.mxu1 %v307_v30 }
 0x13f   : > { %338 = vmatpush1.msra.mxu1 %v305_v29 }
 0x140   : > { %v311_v32 = vpop.f32.mrb[2].mxu0  ;;  %777 = vmatmul.mubr.msk.f32.vlgmr.msra.gmra.mrb[0].mxu1 %vm330_vm1, %v328_v31 }
 0x141   : > { %v313_v33 = vpop.f32.mrb[3].mxu0  ;;  %407 = vmatprep.mubr.f32.mxu1 %v1022_v0 }
 0x142   : > { %418 = vmatprep.subr.mxu1 %v313_v33 }
 0x143   : > { %419 = vmatpush1.msra.mxu1 %v311_v32 }
 0x144   : > { %778 = vmatmul.mubr.msk.f32.gmra.mrb[2].mxu1 %vm330_vm1, %v329_v34  ;;  %v317_v35 = vpop.f32.mrb[4].mxu0 }
 0x145   : > { %v319_v36 = vpop.f32.mrb[5].mxu0  ;;  %482 = vmatprep.mubr.f32.mxu1 %v1022_v0 }
 0x146   : > { %500 = vmatprep.subr.mxu1 %v319_v36 }
 0x148   : > { %779 = vmatmul.mubr.msk.f32.vlgmr.msra.gmra.mrb[4].mxu1 %vm330_vm1, %v328_v31  ;;  %v323_v37 = vpop.f32.mrb[6].mxu0 }
 0x149   : > { %501 = vmatpush1.msra.mxu1 %v317_v35  ;;  %488 = vmatprep.mubr.f32.mxu1 %v1022_v0  ;;  %v325_v38 = vpop.f32.mrb[7].mxu0 }
 0x14a   : > { %582 = vmatprep.subr.mxu1 %v325_v38 }
 0x14c   : > { %780 = vmatmul.mubr.msk.f32.gmra.mrb[6].mxu1 %vm330_vm1, %v329_v34 }
 0x14d   : > { %564 = vmatprep.mubr.f32.mxu1 %v1022_v0 }
 0x150   : > { %785 = vmatmul.mubr.msk.f32.vlgmr.msra.gmra.mrb[8].mxu1 %vm330_vm1, %v328_v31 }
 0x151   : > { %583 = vmatpush1.msra.mxu1 %v323_v37  ;;  %570 = vmatprep.mubr.f32.mxu1 %v1022_v0 }
 0x154   : > { %786 = vmatmul.mubr.msk.f32.gmra.mrb[10].mxu1 %vm330_vm1, %v329_v34 }
 0x155   : > { %646 = vmatprep.mubr.f32.mxu1 %v1022_v0 }
 0x158   : > { %791 = vmatmul.mubr.msk.f32.vlgmr.msra.gmra.mrb[12].mxu1 %vm330_vm1, %v328_v31 }
 0x159   : > { %652 = vmatprep.mubr.f32.mxu1 %v1022_v0 }
 0x15c   : > { %792 = vmatmul.mubr.msk.f32.gmra.mrb[14].mxu1 %vm330_vm1, %v329_v34 }
 0x213   : > { %v403_v39 = vpop.f32.mrb[0].mxu1 }
 0x214   : > { %414 = vst [vmem:[%s1230_s5] sm:$0xff] %v403_v39  ;;  %v405_v40 = vpop.f32.mrb[1].mxu1 }
 0x215   : > { %415 = vst [vmem:[%s1230_s5 + $0x8] sm:$0xff] %v405_v40 }
 0x217   : > { %v409_v41 = vpop.f32.mrb[2].mxu1 }
 0x218   : > { %416 = vst [vmem:[%s1230_s5 + $0x10] sm:$0xff] %v409_v41  ;;  %v411_v42 = vpop.f32.mrb[3].mxu1 }
 0x219   : > { %417 = vst [vmem:[%s1230_s5 + $0x18] sm:$0xff] %v411_v42 }
 0x21b   : > { %v484_v43 = vpop.f32.mrb[4].mxu1 }
 0x21c   : > { %781 = vst [vmem:[%s1230_s5 + $0x20] sm:$0xff] %v484_v43  ;;  %v486_v44 = vpop.f32.mrb[5].mxu1 }
 0x21d   : > { %782 = vst [vmem:[%s1230_s5 + $0x28] sm:$0xff] %v486_v44 }
 0x21f   : > { %v490_v45 = vpop.f32.mrb[6].mxu1 }
 0x220   : > { %783 = vst [vmem:[%s1230_s5 + $0x30] sm:$0xff] %v490_v45  ;;  %v492_v46 = vpop.f32.mrb[7].mxu1 }
 0x221   : > { %784 = vst [vmem:[%s1230_s5 + $0x38] sm:$0xff] %v492_v46 }
 0x223   : > { %v566_v47 = vpop.f32.mrb[8].mxu1 }
 0x224   : > { %787 = vst [vmem:[%s1230_s5 + $0x40] sm:$0xff] %v566_v47  ;;  %v568_v48 = vpop.f32.mrb[9].mxu1 }
 0x225   : > { %788 = vst [vmem:[%s1230_s5 + $0x48] sm:$0xff] %v568_v48 }
 0x227   : > { %v572_v49 = vpop.f32.mrb[10].mxu1 }
 0x228   : > { %789 = vst [vmem:[%s1230_s5 + $0x50] sm:$0xff] %v572_v49  ;;  %v574_v50 = vpop.f32.mrb[11].mxu1 }
 0x229   : > { %790 = vst [vmem:[%s1230_s5 + $0x58] sm:$0xff] %v574_v50 }
 0x22b   : > { %v648_v51 = vpop.f32.mrb[12].mxu1 }
 0x22c   : > { %793 = vst [vmem:[%s1230_s5 + $0x60] sm:$0xff] %v648_v51  ;;  %v650_v52 = vpop.f32.mrb[13].mxu1 }
 0x22d   : > { %794 = vst [vmem:[%s1230_s5 + $0x68] sm:$0xff] %v650_v52 }
 0x22f   : > { %v654_v53 = vpop.f32.mrb[14].mxu1 }
 0x230   : > { %795 = vst [vmem:[%s1230_s5 + $0x70] sm:$0xff] %v654_v53  ;;  %v656_v54 = vpop.f32.mrb[15].mxu1 }
 0x231   : > { %796 = vst [vmem:[%s1230_s5 + $0x78] sm:$0xff] %v656_v54 }
 0x232   : > { %957 = shalt.err (!%p954_p7)
}
 0x233   : > { %s958_s8 = scalar_lea.hbm %s1251_s29, 2048  ;;  %s962_s20 = scalar_lea.hbm %s1302_s3, 4096 }
 0x234   : > { %p959_p9 = scmp.ne.s32.totalorder %s1251_s29, %s958_s8  ;;  %p963_p5 = scmp.lt.u32.totalorder %s1251_s29, %s1302_s3 }
 0x235   : > { %p964_p11 = scmp.lt.u32.totalorder %s962_s20, %s958_s8  ;;  %p966_p4 = scmp.lt.u32.totalorder %s958_s8, %s1251_s29 }
 0x236   : > { %p960_p2 = pnand %p959_p9, %p1137_p12 }
 0x237   : > { %p965_p1 = por %p964_p11, %p963_p5 }
 0x238   : > { %p961_p0 = pneg %p960_p2 }
 0x239   : > { %p967_p6 = por %p966_p4, %p965_p1 }
 0x23b   : > { %p968_p8 = pnand %p967_p6, %p961_p0 }
 0x23d   : > { %971 = shalt.err (!%p968_p8)
}
 0x23e   : > { %s1024_s26 = smov 256   ;;  %s1025_s5 = smov 16  }
 0x23f   : > { %828 = dma.vmem_to_hbm [thread:$0]  (%p1137_p12), %s1253_s11, 2048, %s1251_s29, %s665_s23, %s1024_s26, %s1024_s26, %s1025_s5  }
 0x240 PF: > { %s694_s10 = sand.u32 1, %s1002_s12   ;;  %p1317_p10 = scmp.ne.s32.totalorder %s1307_s19, 0 }
 0x241   : > { %p1318_p13 = scmp.ge.s32.totalorder %s1014_s15, 2  ;;  %s695_s27 = scalar_lea.sflag [#allocation4], %s694_s10 }
 0x243   : > { %p839_p3 = pnand %p1318_p13, %p1317_p10 }
 0x245   : > { %997 = dma.done.wait (!%p839_p3), %s695_s27, 2048  }
 0x246   : > { %999 = vsyncadd (!%p839_p3), %s695_s27, 4294965248  ;;  %p17_p7 = scmp.ge.s32.totalorder %s1102_s24, 4   ;;  %s1319_s12 = smov %s1006_s13 }
 0x247   : > { %s1320_s13 = smov %s1010_s14  ;;  %s1321_s14 = smov %s1133_s17 }
 0x248   : > { %s1322_s15 = smov %s1102_s24  ;;  %19 = sbr.rel (!%p17_p7) target bundleno = 6 (0x6), region = 84 }
 0x24f   :  { %700 = vsyncpa [#allocation3], 1 }
 0x250   :  { %702 = vsyncpa [#allocation3 + $0x1], 1 }
 0x251   :  { %703 = vsyncpa [#allocation6], 1 }
 0x252   :  { %704 = vsyncpa [#allocation4], 1 }
 0x253   :  { %706 = vsyncpa [#allocation4 + $0x1], 1 }

</bundles_post_ra>
